<compile_context>
chip_gen: v7x
topology: tpu7x:2x2x1
jax: 0.10.0
libtpu: 0.0.40
codegen_flags: <defaults>
</compile_context>

<pallas_src>
import functools

import jax
import jax.numpy as jnp
from jax.experimental import pallas as pl
from jax.experimental.pallas import tpu as pltpu

LANES = 128      # TPU lane width (last dim of every padded tile)
SUBLANES = 8     # f32 sublane count (batch-tile granularity)
SEG_ALIGN = 16   # slab segment row alignment (bf16 sublane pack)


def _round_up(x, m):
    return (x + m - 1) // m * m


# ----------------------------------------------------------------------------
# Kernel: one batch tile, 4 fused layers, params read from one resident slab.
# ----------------------------------------------------------------------------
def _dueling_kernel(x_ref, slab_ref, out_ref, *, offs, compute_dtype):
    def seg(name):
        off, seg_rows, k_rows = offs[name]        # static python ints
        v = slab_ref[off:off + seg_rows, :]       # pack-aligned static load
        return v[:k_rows, :] if k_rows != seg_rows else v

    def dense(h, wname, bname):
        y = jnp.dot(h.astype(compute_dtype), seg(wname),
                    preferred_element_type=jnp.float32)
        return y + seg(bname).astype(jnp.float32)          # bias add in f32

    h = jnp.maximum(dense(x_ref[...], "w1", "b1"), 0.0)     # (TM, 128)
    h = jnp.maximum(dense(h, "w2", "b2"), 0.0)
    h = jnp.maximum(dense(h, "w3", "b3"), 0.0)              # fused value|adv hidden
    # Folded head: lanes 0..A-1 = Q, lane A = raw value stream, rest ~ 0.
    out_ref[...] = dense(h, "w4", "b4")


# ----------------------------------------------------------------------------
# Host-side packing: fuse heads, fold dueling combine, build one (rows,128) slab.
# ----------------------------------------------------------------------------
def pack_params(params, state_size, action_size, dtype=jnp.bfloat16):
    S, A = state_size, action_size
    K1 = _round_up(S, SEG_ALIGN)      # padded input width the kernel expects

    # Fuse the two dueling-stream hidden layers: h3 = relu(h2 @ [w31|w32] + [b31|b32])
    w3 = jnp.concatenate([params["w31"], params["w32"]], axis=1)          # (64, 64)
    b3 = jnp.concatenate([params["b31"], params["b32"]], axis=1)          # (1, 64)

    # Head with the dueling combine folded in.  Advantages -> lanes 0..A-1,
    # value -> lane A.  shift = V - mean(adv) is added to the A prefix lanes
    # only, so lanes 0..A-1 produce Q directly; lane A keeps raw V.
    w4 = (jnp.zeros((64, LANES), jnp.float32)
          .at[:32, A:A + 1].set(params["w41"].astype(jnp.float32))
          .at[32:, 0:A].set(params["w42"].astype(jnp.float32)))
    b4 = (jnp.zeros((1, LANES), jnp.float32)
          .at[:, A:A + 1].set(params["b41"].astype(jnp.float32))
          .at[:, 0:A].set(params["b42"].astype(jnp.float32)))
    c = (jnp.zeros((LANES, 1), jnp.float32)
         .at[0:A, 0].set(-1.0 / A)
         .at[A, 0].set(1.0))                                              # V - mean(adv)
    prefix = jnp.zeros((1, LANES), jnp.float32).at[0, 0:A].set(1.0)
    w4 = w4 + (w4 @ c) @ prefix
    b4 = b4 + (b4 @ c) @ prefix

    # (name, array, padded segment rows, K rows the kernel actually reads)
    entries = [
        ("w1", params["w1"], K1, K1),        # input zero-padded to K1 cols on host
        ("b1", params["b1"], SEG_ALIGN, 1),
        ("w2", params["w2"], LANES, LANES),  # hidden carried at 128 lanes (zero pad)
        ("b2", params["b2"], SEG_ALIGN, 1),
        ("w3", w3, LANES, LANES),
        ("b3", b3, SEG_ALIGN, 1),
        ("w4", w4, LANES, LANES),
        ("b4", b4, SEG_ALIGN, 1),
    ]
    blocks, offs, row = [], {}, 0
    for name, arr, seg_rows, k_rows in entries:
        blk = jnp.zeros((seg_rows, LANES), jnp.float32)
        blk = blk.at[:arr.shape[0], :arr.shape[1]].set(arr.astype(jnp.float32))
        blocks.append(blk)
        offs[name] = (row, seg_rows, k_rows)
        row += seg_rows
    slab = jnp.concatenate(blocks, axis=0).astype(dtype)
    return slab, offs


# ----------------------------------------------------------------------------
# Wrapper: batch-tiled grid, parameter slab pinned in VMEM across grid steps.
# ----------------------------------------------------------------------------
def dueling_q_forward(state, slab, offs, action_size, *, block_m=1024):
    B, S = state.shape
    K1 = offs["w1"][2]

    # Batch tile: as big as block_m allows, but >= 2 tiles when the batch is
    # big enough so v7x can split the "parallel" axis across both TensorCores.
    bp8 = _round_up(B, SUBLANES)
    if bp8 <= SUBLANES:
        tm = bp8
    else:
        tm = min(block_m, _round_up((bp8 + 1) // 2, SUBLANES))
    bp = _round_up(B, tm)

    x = state
    if bp != B or K1 != S:
        x = jnp.pad(state, ((0, bp - B), (0, K1 - S)))

    kernel = functools.partial(_dueling_kernel, offs=offs, compute_dtype=slab.dtype)

    out = pl.pallas_call(
        kernel,
        out_shape=jax.ShapeDtypeStruct((bp, LANES), jnp.float32),
        grid_spec=pltpu.PrefetchScalarGridSpec(
            num_scalar_prefetch=0,
            grid=(bp // tm,),
            in_specs=[
                pl.BlockSpec((tm, K1), lambda i: (i, 0)),        # batch tile
                pl.BlockSpec(slab.shape, lambda i: (0, 0)),      # params: one DMA, resident
            ],
            out_specs=pl.BlockSpec((tm, LANES), lambda i: (i, 0)),
        ),
        compiler_params=pltpu.CompilerParams(
            dimension_semantics=("parallel",),   # v7x: split batch tiles across both TCs
        ),
    )(x, slab)

    # Q values live in the lane prefix 0..A-1 (lane A = raw V, padded rows = garbage).
    return out[:B, :action_size]


# ----------------------------------------------------------------------------
# Init + pure-JAX reference (matches the PyTorch forward exactly).
# ----------------------------------------------------------------------------
def init_params(key, state_size, action_size, fc1_size=64, fc2_size=64):
    fc3_1_size = fc3_2_size = 32
    dims = [
        ("w1", "b1", state_size, fc1_size),
        ("w2", "b2", fc1_size, fc2_size),
        ("w31", "b31", fc2_size, fc3_1_size),
        ("w41", "b41", fc3_1_size, 1),
        ("w32", "b32", fc2_size, fc3_2_size),
        ("w42", "b42", fc3_2_size, action_size),
    ]
    params = {}
    for wname, bname, fan_in, fan_out in dims:
        key, kw, kb = jax.random.split(key, 3)
        bound = 1.0 / jnp.sqrt(jnp.float32(fan_in))
        params[wname] = jax.random.uniform(
            kw, (fan_in, fan_out), jnp.float32, minval=-bound, maxval=bound)
        params[bname] = jax.random.uniform(
            kb, (1, fan_out), jnp.float32, minval=-bound, maxval=bound)
    return params


def dueling_q_reference(state, params):
    h1 = jnp.maximum(state @ params["w1"] + params["b1"], 0.0)
    h2 = jnp.maximum(h1 @ params["w2"] + params["b2"], 0.0)
    v = jnp.maximum(h2 @ params["w31"] + params["b31"], 0.0)
    val = v @ params["w41"] + params["b41"]
    a = jnp.maximum(h2 @ params["w32"] + params["b32"], 0.0)
    adv = a @ params["w42"] + params["b42"]
    return val + adv - jnp.mean(adv, axis=1, keepdims=True)


if __name__ == "__main__":
    key = jax.random.PRNGKey(0)
    state_size = 8      # LunarLander observation dim
    action_size = 4     # LunarLander action count
    batch = 2

    key, pkey, xkey, xkey2 = jax.random.split(key, 4)
    params = init_params(pkey, state_size, action_size)

    state = jax.random.normal(xkey, (batch, state_size), jnp.float32)
    big = jax.random.normal(xkey2, (512, state_size), jnp.float32)
    ref = dueling_q_reference(state, params)
    ref_big = dueling_q_reference(big, params)

    # --- f32 slab path: tight check of the fused/folded math ------------------
    slab32, offs32 = pack_params(params, state_size, action_size, dtype=jnp.float32)
    out32 = jax.block_until_ready(dueling_q_forward(state, slab32, offs32, action_size))
    assert out32.shape == (batch, action_size)
    assert jnp.allclose(out32, ref, atol=1e-4, rtol=1e-4), (out32, ref)

    # --- bf16 slab path (default fast path): looser tolerance vs f32 reference -
    slab16, offs16 = pack_params(params, state_size, action_size)          # bf16
    out = jax.block_until_ready(dueling_q_forward(state, slab16, offs16, action_size))
    assert out.shape == (batch, action_size)
    assert jnp.allclose(out, ref, atol=3e-2, rtol=3e-2), (out, ref)

    # Gridded, megacore-parallel path (exercises the >=2-tile batch split).
    out_big = jax.block_until_ready(dueling_q_forward(big, slab16, offs16, action_size))
    assert jnp.allclose(out_big, ref_big, atol=3e-2, rtol=3e-2)

    print("KERNEL_OK")
</pallas_src>

<mosaic_0001>
module attributes {stable_mosaic.version = 11 : i64} {
  func.func @_dueling_kernel(%arg0: i32, %arg1: memref<8x16xf32, #tpu.memory_space<vmem>>, %arg2: memref<464x128xf32, #tpu.memory_space<vmem>>, %arg3: memref<8x128xf32, #tpu.memory_space<vmem>>) attributes {dimension_semantics = [#tpu.dimension_semantics<parallel>], iteration_bounds = array<i64: 1>, scalar_prefetch = 0 : i64, scratch_operands = 0 : i64, tpu.core_type = #tpu.core_type<tc>, window_params = [{transform_indices = @transform_0, window_bounds = array<i64: 8, 16>}, {pipeline_mode = #tpu.pipeline_mode<synchronous>, transform_indices = @transform_1, window_bounds = array<i64: 464, 128>}, {transform_indices = @transform_2, window_bounds = array<i64: 8, 128>}]} {
    %c0 = arith.constant 0 : index
    %c0_0 = arith.constant 0 : index
    %0 = vector.load %arg1[%c0, %c0_0] : memref<8x16xf32, #tpu.memory_space<vmem>>, vector<8x16xf32>
    %c0_1 = arith.constant 0 : index
    %c0_2 = arith.constant 0 : index
    %1 = vector.load %arg2[%c0_1, %c0_2] : memref<464x128xf32, #tpu.memory_space<vmem>>, vector<16x128xf32>
    %cst = arith.constant dense<0.000000e+00> : vector<8x128xf32>
    %2 = tpu.matmul %0, %1, %cst {dimension_numbers = #tpu.dot_dimension_numbers<[1], [0], [0], [1], [0, 0, 1, 1], [], []>} : vector<8x16xf32>, vector<16x128xf32>, vector<8x128xf32> -> vector<8x128xf32>
    %c16 = arith.constant 16 : index
    %c0_3 = arith.constant 0 : index
    %3 = vector.load %arg2[%c16, %c0_3] : memref<464x128xf32, #tpu.memory_space<vmem>>, vector<16x128xf32>
    %4 = vector.extract_strided_slice %3 {offsets = [0, 0], sizes = [1, 128], strides = [1, 1]} : vector<16x128xf32> to vector<1x128xf32>
    %5 = vector.broadcast %4 : vector<1x128xf32> to vector<8x128xf32>
    %6 = arith.addf %2, %5 : vector<8x128xf32>
    %cst_4 = arith.constant 0.000000e+00 : f32
    %7 = vector.broadcast %cst_4 : f32 to vector<8x128xf32>
    %8 = arith.maximumf %6, %7 : vector<8x128xf32>
    %c32 = arith.constant 32 : index
    %c0_5 = arith.constant 0 : index
    %9 = vector.load %arg2[%c32, %c0_5] : memref<464x128xf32, #tpu.memory_space<vmem>>, vector<128x128xf32>
    %cst_6 = arith.constant dense<0.000000e+00> : vector<8x128xf32>
    %10 = tpu.matmul %8, %9, %cst_6 {dimension_numbers = #tpu.dot_dimension_numbers<[1], [0], [0], [1], [0, 0, 1, 1], [], []>} : vector<8x128xf32>, vector<128x128xf32>, vector<8x128xf32> -> vector<8x128xf32>
    %c160 = arith.constant 160 : index
    %c0_7 = arith.constant 0 : index
    %11 = vector.load %arg2[%c160, %c0_7] : memref<464x128xf32, #tpu.memory_space<vmem>>, vector<16x128xf32>
    %12 = vector.extract_strided_slice %11 {offsets = [0, 0], sizes = [1, 128], strides = [1, 1]} : vector<16x128xf32> to vector<1x128xf32>
    %13 = vector.broadcast %12 : vector<1x128xf32> to vector<8x128xf32>
    %14 = arith.addf %10, %13 : vector<8x128xf32>
    %cst_8 = arith.constant 0.000000e+00 : f32
    %15 = vector.broadcast %cst_8 : f32 to vector<8x128xf32>
    %16 = arith.maximumf %14, %15 : vector<8x128xf32>
    %c176 = arith.constant 176 : index
    %c0_9 = arith.constant 0 : index
    %17 = vector.load %arg2[%c176, %c0_9] : memref<464x128xf32, #tpu.memory_space<vmem>>, vector<128x128xf32>
    %cst_10 = arith.constant dense<0.000000e+00> : vector<8x128xf32>
    %18 = tpu.matmul %16, %17, %cst_10 {dimension_numbers = #tpu.dot_dimension_numbers<[1], [0], [0], [1], [0, 0, 1, 1], [], []>} : vector<8x128xf32>, vector<128x128xf32>, vector<8x128xf32> -> vector<8x128xf32>
    %c304 = arith.constant 304 : index
    %c0_11 = arith.constant 0 : index
    %19 = vector.load %arg2[%c304, %c0_11] : memref<464x128xf32, #tpu.memory_space<vmem>>, vector<16x128xf32>
    %20 = vector.extract_strided_slice %19 {offsets = [0, 0], sizes = [1, 128], strides = [1, 1]} : vector<16x128xf32> to vector<1x128xf32>
    %21 = vector.broadcast %20 : vector<1x128xf32> to vector<8x128xf32>
    %22 = arith.addf %18, %21 : vector<8x128xf32>
    %cst_12 = arith.constant 0.000000e+00 : f32
    %23 = vector.broadcast %cst_12 : f32 to vector<8x128xf32>
    %24 = arith.maximumf %22, %23 : vector<8x128xf32>
    %c320 = arith.constant 320 : index
    %c0_13 = arith.constant 0 : index
    %25 = vector.load %arg2[%c320, %c0_13] : memref<464x128xf32, #tpu.memory_space<vmem>>, vector<128x128xf32>
    %cst_14 = arith.constant dense<0.000000e+00> : vector<8x128xf32>
    %26 = tpu.matmul %24, %25, %cst_14 {dimension_numbers = #tpu.dot_dimension_numbers<[1], [0], [0], [1], [0, 0, 1, 1], [], []>} : vector<8x128xf32>, vector<128x128xf32>, vector<8x128xf32> -> vector<8x128xf32>
    %c448 = arith.constant 448 : index
    %c0_15 = arith.constant 0 : index
    %27 = vector.load %arg2[%c448, %c0_15] : memref<464x128xf32, #tpu.memory_space<vmem>>, vector<16x128xf32>
    %28 = vector.extract_strided_slice %27 {offsets = [0, 0], sizes = [1, 128], strides = [1, 1]} : vector<16x128xf32> to vector<1x128xf32>
    %29 = vector.broadcast %28 : vector<1x128xf32> to vector<8x128xf32>
    %30 = arith.addf %26, %29 : vector<8x128xf32>
    %c0_16 = arith.constant 0 : index
    %c0_17 = arith.constant 0 : index
    %31 = vector.load %arg3[%c0_16, %c0_17] : memref<8x128xf32, #tpu.memory_space<vmem>>, vector<8x128xf32>
    tpu.vector_store %arg3[%c0_16, %c0_17], %30 {strides = array<i32>} : memref<8x128xf32, #tpu.memory_space<vmem>>, vector<8x128xf32>,
    return
  }
  func.func @transform_0(%arg0: i32) -> (i32, i32) {
    %c0_i32 = arith.constant 0 : i32
    %c0_i32_0 = arith.constant 0 : i32
    return %arg0, %c0_i32 : i32, i32
  }
  func.func @transform_1(%arg0: i32) -> (i32, i32) {
    %c0_i32 = arith.constant 0 : i32
    %c0_i32_0 = arith.constant 0 : i32
    %c0_i32_1 = arith.constant 0 : i32
    return %c0_i32, %c0_i32_0 : i32, i32
  }
  func.func @transform_2(%arg0: i32) -> (i32, i32) {
    %c0_i32 = arith.constant 0 : i32
    %c0_i32_0 = arith.constant 0 : i32
    return %arg0, %c0_i32 : i32, i32
  }
}

</mosaic_0001>

<bundles_post_ra>
// kernel: tpu_custom_call.1
= control target key start
LH: loop header
LB: loop body
LE: loop exit
PB: predicated region body
PF: predicated region fallthrough
CT: control target
= control target key end

     0   :  { %7 = vsyncpa [#allocation3], 0  ;;  %s840_s0 = inlined_call_operand.hbm [shape: f32[8,16], index: 0, kind: input, shape index: {}]   ;;  %s841_s1 = inlined_call_operand.hbm [shape: f32[464,128], index: 1, kind: input, shape index: {}]   ;;  %s842_s2 = inlined_call_operand.hbm [shape: f32[8,128], index: 2, kind: output, shape index: {}]  }
   0x1   :  { %8 = vsyncpa [#allocation6], 0 }
   0x2   :  { %9 = vsyncpa [#allocation4], 0  ;;  %s735_s9 = smov [#allocation2]   ;;  %s736_s11 = smov [#allocation5]  }
   0x3   :  { %s16_s10 = sshll.u32 %s735_s9, 4  ;;  %s25_s12 = sshll.u32 %s736_s11, 4  ;;  %s17_s10 = int_to_ptr.vmem [resolvable:$true] %s16_s10  ;;  %s758_s12 = int_to_ptr.vmem [resolvable:$true] %s25_s12 }
   0x4   :  { %s663_s15 = scalar_lea.hbm %s840_s0, 128 }
   0x5   :  { %p664_p0 = scmp.ne.s32.totalorder %s840_s0, %s663_s15  ;;  %p667_p1 = scmp.lt.u32.totalorder %s663_s15, %s840_s0 }
   0x7   :  { %p669_p2 = pnand %p667_p1, %p664_p0 }
   0x9   :  { %672 = shalt.err (!%p669_p2)
}
   0xa   :  { %s673_s20 = scalar_lea.vmem %s17_s10, 128  ;;  %p678_p4 = scmp.lt.s32.totalorder %s17_s10, %s17_s10 }
   0xb   :  { %p674_p3 = scmp.ne.s32.totalorder %s17_s10, %s673_s20  ;;  %p679_p5 = scmp.lt.s32.totalorder %s673_s20, %s673_s20 }
   0xd   :  { %p680_p6 = por %p679_p5, %p678_p4 }
   0xf   :  { %p681_p7 = pnand %p680_p6, %p674_p3 }
  0x11   :  { %684 = shalt.err (!%p681_p7)
}
  0x12   :  { %19 = dma.hbm_to_vmem [thread:$0]  %s840_s0, 128, %s17_s10, [#allocation3]  }
  0x13   :  { %s685_s25 = scalar_lea.hbm %s841_s1, 7424 }
  0x14   :  { %p686_p8 = scmp.ne.s32.totalorder %s841_s1, %s685_s25  ;;  %p689_p9 = scmp.lt.u32.totalorder %s685_s25, %s841_s1 }
  0x16   :  { %p691_p10 = pnand %p689_p9, %p686_p8 }
  0x18   :  { %694 = shalt.err (!%p691_p10)
}
  0x19   :  { %s695_s30 = scalar_lea.vmem %s758_s12, 7424  ;;  %p700_p12 = scmp.lt.s32.totalorder %s758_s12, %s758_s12 }
  0x1a   :  { %p696_p11 = scmp.ne.s32.totalorder %s758_s12, %s695_s30  ;;  %p701_p13 = scmp.lt.s32.totalorder %s695_s30, %s695_s30 }
  0x1c   :  { %p702_p0 = por %p701_p13, %p700_p12 }
  0x1e   :  { %p703_p1 = pnand %p702_p0, %p696_p11 }
  0x20   :  { %706 = shalt.err (!%p703_p1)
}
  0x21   :  { %s737_s0 = smov 128   ;;  %s738_s3 = smov 8  }
  0x22   :  { %31 = dma.hbm_to_vmem [thread:$0]  %s841_s1, 7424, %s758_s12, [#allocation6], %s737_s0, %s737_s0, %s738_s3  }
  0x23   :  { %729 = dma.done.wait [#allocation3], 128  }
  0x24   :  { %730 = vsyncadd [#allocation3], 4294967168 }
  0x25   :  { %731 = dma.done.wait [#allocation6], 7424  }
  0x26   :  { %732 = vsyncadd [#allocation6], 4294959872  ;;  %v739_v0 = vmov 0.0|0.0   ;;  %vm740_vm0 = vmmov 0   ;;  %v741_v1 = vmov 0.0   ;;  %v39_v2 = vld [vmem:[#allocation5] sm:$0xff]  ;;  %v42_v51 = vlaneseq }
  0x27   :  { %580 = vmatprep.subr.bf16.mxu0 %v739_v0  ;;  %472 = vmatprep.mubr.msk.f32.mxu0 %vm740_vm0, %v741_v1  ;;  %v40_v3 = vld [vmem:[#allocation5 + $0x8] sm:$0xff]  ;;  %v121_v5 = vld [vmem:[#allocation5 + $0x20] sm:$0xff]  ;;  %v123_v7 = vld [vmem:[#allocation5 + $0x30] sm:$0xff]  ;;  %vm46_vm1 = vcmask 130048   ;;  %s742_s1 = smov [#allocation7]  }
  0x28   :  { %583 = vmatprep.subr.bf16.mxu1 %v739_v0  ;;  %507 = vmatprep.mubr.msk.f32.mxu1 %vm740_vm0, %v741_v1  ;;  %v581_v4 = vpack.c.bf16 %v40_v3, %v39_v2  ;;  %v122_v6 = vld [vmem:[#allocation5 + $0x28] sm:$0xff]  ;;  %v124_v9 = vld [vmem:[#allocation5 + $0x38] sm:$0xff]  ;;  %v125_v12 = vld [vmem:[#allocation5 + $0x40] sm:$0xff]  ;;  %v43_v52 = vshrl.u32 %v42_v51, 7  ;;  %s403_s6 = sshll.u32 %s742_s1, 4  ;;  %s404_s6 = int_to_ptr.vmem [resolvable:$true] %s403_s6 }
  0x29   :  { %v584_v8 = vpack.c.bf16 %v122_v6, %v121_v5  ;;  %v38_v10 = vld [vmem:[#allocation2] sm:$0xff]  ;;  %v587_v11 = vpack.c.bf16 %v124_v9, %v123_v7  ;;  %v126_v13 = vld [vmem:[#allocation5 + $0x48] sm:$0xff]  ;;  %v127_v15 = vld [vmem:[#allocation5 + $0x50] sm:$0xff]  ;;  %s707_s7 = scalar_lea.vmem %s404_s6, 128  ;;  %p712_p3 = scmp.lt.s32.totalorder %s404_s6, %s404_s6 }
  0x2a   :  { %582 = vmatpush3.bf16.msra.mxu0 %v581_v4  ;;  %v590_v14 = vpack.c.bf16 %v126_v13, %v125_v12  ;;  %v128_v16 = vld [vmem:[#allocation5 + $0x58] sm:$0xff]  ;;  %v129_v18 = vld [vmem:[#allocation5 + $0x60] sm:$0xff]  ;;  %v130_v19 = vld [vmem:[#allocation5 + $0x68] sm:$0xff]  ;;  %v813_v53 = vsub.s32 0, %v43_v52  ;;  %p708_p2 = scmp.ne.s32.totalorder %s404_s6, %s707_s7  ;;  %p713_p4 = scmp.lt.s32.totalorder %s707_s7, %s707_s7 }
  0x2b   :  { %585 = vmatpush3.bf16.msra.mxu1 %v584_v8  ;;  %607 = vmatprep.subr.bf16.mxu0 %v739_v0  ;;  %v593_v17 = vpack.c.bf16 %v128_v16, %v127_v15  ;;  %v596_v20 = vpack.c.bf16 %v130_v19, %v129_v18  ;;  %v131_v21 = vld [vmem:[#allocation5 + $0x70] sm:$0xff]  ;;  %v132_v22 = vld [vmem:[#allocation5 + $0x78] sm:$0xff]  ;;  %v133_v24 = vld [vmem:[#allocation5 + $0x80] sm:$0xff] }
  0x2c   :  { %586 = vmatprep.subr.bf16.mxu1 %v739_v0  ;;  %v599_v23 = vpack.c.bf16 %v132_v22, %v131_v21  ;;  %v134_v25 = vld [vmem:[#allocation5 + $0x88] sm:$0xff]  ;;  %v135_v27 = vld [vmem:[#allocation5 + $0x90] sm:$0xff]  ;;  %v136_v28 = vld [vmem:[#allocation5 + $0x98] sm:$0xff]  ;;  %p714_p5 = por %p713_p4, %p712_p3 }
  0x2d   :  { %473 = vmatmul.mubr.msk.f32.vlgmr.msra.gmra.mrb[0].mxu0 %vm46_vm1, %v38_v10  ;;  %v602_v26 = vpack.c.bf16 %v134_v25, %v133_v24  ;;  %v605_v29 = vpack.c.bf16 %v136_v28, %v135_v27  ;;  %v213_v30 = vld [vmem:[#allocation5 + $0xb0] sm:$0xff]  ;;  %v214_v31 = vld [vmem:[#allocation5 + $0xb8] sm:$0xff]  ;;  %v215_v32 = vld [vmem:[#allocation5 + $0xc0] sm:$0xff] }
  0x2e   :  { %542 = vmatprep.mubr.msk.f32.mxu0 %vm740_vm0, %v741_v1  ;;  %v608_v33 = vpack.c.bf16 %v214_v31, %v213_v30  ;;  %v216_v34 = vld [vmem:[#allocation5 + $0xc8] sm:$0xff]  ;;  %v217_v36 = vld [vmem:[#allocation5 + $0xd0] sm:$0xff]  ;;  %v218_v37 = vld [vmem:[#allocation5 + $0xd8] sm:$0xff]  ;;  %p715_p6 = pnand %p714_p5, %p708_p2 }
  0x2f   :  { %588 = vmatpush3.bf16.msra.mxu1 %v587_v11  ;;  %v611_v35 = vpack.c.bf16 %v216_v34, %v215_v32  ;;  %v614_v38 = vpack.c.bf16 %v218_v37, %v217_v36  ;;  %v219_v39 = vld [vmem:[#allocation5 + $0xe0] sm:$0xff]  ;;  %v220_v40 = vld [vmem:[#allocation5 + $0xe8] sm:$0xff]  ;;  %v221_v42 = vld [vmem:[#allocation5 + $0xf0] sm:$0xff] }
  0x30   :  { %589 = vmatprep.subr.bf16.mxu1 %v739_v0  ;;  %609 = vmatpush3.bf16.msra.mxu0 %v608_v33  ;;  %v617_v41 = vpack.c.bf16 %v220_v40, %v219_v39  ;;  %v222_v43 = vld [vmem:[#allocation5 + $0xf8] sm:$0xff]  ;;  %v223_v45 = vld [vmem:[#allocation5 + $0x100] sm:$0xff]  ;;  %v224_v46 = vld [vmem:[#allocation5 + $0x108] sm:$0xff] }
  0x31   :  { %610 = vmatprep.subr.bf16.mxu0 %v739_v0  ;;  %v620_v44 = vpack.c.bf16 %v222_v43, %v221_v42  ;;  %v623_v47 = vpack.c.bf16 %v224_v46, %v223_v45  ;;  %v225_v48 = vld [vmem:[#allocation5 + $0x110] sm:$0xff]  ;;  %v226_v49 = vld [vmem:[#allocation5 + $0x118] sm:$0xff]  ;;  %v227_v60 = vld [vmem:[#allocation5 + $0x120] sm:$0xff] }
  0x32   :  { %v626_v50 = vpack.c.bf16 %v226_v49, %v225_v48  ;;  %v41_v54 = vld [vmem:[#allocation5 + $0x10] sm:$0xff]  ;;  %v228_v61 = vld [vmem:[#allocation5 + $0x128] sm:$0xff]  ;;  %v305_v63 = vld [vmem:[#allocation5 + $0x140] sm:$0xff] }
  0x33   :  { %591 = vmatpush3.bf16.msra.mxu1 %v590_v14  ;;  %v45_v55 = vrot.slane %v41_v54, %v813_v53  ;;  %v629_v62 = vpack.c.bf16 %v228_v61, %v227_v60  ;;  %v306_v2 = vld [vmem:[#allocation5 + $0x148] sm:$0xff]  ;;  %v307_v3 = vld [vmem:[#allocation5 + $0x150] sm:$0xff]  ;;  %v308_v5 = vld [vmem:[#allocation5 + $0x158] sm:$0xff] }
  0x34   :  { %592 = vmatprep.subr.bf16.mxu1 %v739_v0  ;;  %612 = vmatpush3.bf16.msra.mxu0 %v611_v35  ;;  %v632_v4 = vpack.c.bf16 %v306_v2, %v305_v63  ;;  %v635_v6 = vpack.c.bf16 %v308_v5, %v307_v3  ;;  %v309_v7 = vld [vmem:[#allocation5 + $0x160] sm:$0xff]  ;;  %v310_v8 = vld [vmem:[#allocation5 + $0x168] sm:$0xff]  ;;  %v312_v10 = vld [vmem:[#allocation5 + $0x178] sm:$0xff] }
  0x35   :  { %613 = vmatprep.subr.bf16.mxu0 %v739_v0  ;;  %v638_v9 = vpack.c.bf16 %v310_v8, %v309_v7  ;;  %v313_v12 = vld [vmem:[#allocation5 + $0x180] sm:$0xff]  ;;  %v314_v13 = vld [vmem:[#allocation5 + $0x188] sm:$0xff]  ;;  %v315_v15 = vld [vmem:[#allocation5 + $0x190] sm:$0xff] }
  0x36   :  { %v644_v14 = vpack.c.bf16 %v314_v13, %v313_v12  ;;  %v316_v16 = vld [vmem:[#allocation5 + $0x198] sm:$0xff]  ;;  %v317_v18 = vld [vmem:[#allocation5 + $0x1a0] sm:$0xff]  ;;  %v318_v19 = vld [vmem:[#allocation5 + $0x1a8] sm:$0xff] }
  0x37   :  { %594 = vmatpush3.bf16.msra.mxu1 %v593_v17  ;;  %v647_v17 = vpack.c.bf16 %v316_v16, %v315_v15  ;;  %v137_v21 = vld [vmem:[#allocation5 + $0xa0] sm:$0xff]  ;;  %v319_v27 = vld [vmem:[#allocation5 + $0x1b0] sm:$0xff]  ;;  %v320_v28 = vld [vmem:[#allocation5 + $0x1b8] sm:$0xff] }
  0x38   :  { %595 = vmatprep.subr.bf16.mxu1 %v739_v0  ;;  %615 = vmatpush3.bf16.msra.mxu0 %v614_v38  ;;  %v141_v22 = vrot.slane %v137_v21, %v813_v53  ;;  %v229_v30 = vld [vmem:[#allocation5 + $0x130] sm:$0xff] }
  0x39   :  { %616 = vmatprep.subr.bf16.mxu0 %v739_v0  ;;  %v233_v31 = vrot.slane %v229_v30, %v813_v53 }
  0x3b   :  { %597 = vmatpush3.bf16.msra.mxu1 %v596_v20  ;;  %v650_v20 = vpack.c.bf16 %v318_v19, %v317_v18 }
  0x3c   :  { %598 = vmatprep.subr.bf16.mxu1 %v739_v0  ;;  %618 = vmatpush3.bf16.msra.mxu0 %v617_v41 }
  0x3d   :  { %619 = vmatprep.subr.bf16.mxu0 %v739_v0 }
  0x3f   :  { %600 = vmatpush3.bf16.msra.mxu1 %v599_v23 }
  0x40   :  { %601 = vmatprep.subr.bf16.mxu1 %v739_v0  ;;  %621 = vmatpush3.bf16.msra.mxu0 %v620_v44 }
  0x41   :  { %622 = vmatprep.subr.bf16.mxu0 %v739_v0 }
  0x43   :  { %603 = vmatpush3.bf16.msra.mxu1 %v602_v26 }
  0x44   :  { %604 = vmatprep.subr.bf16.mxu1 %v739_v0  ;;  %624 = vmatpush3.bf16.msra.mxu0 %v623_v47 }
  0x45   :  { %625 = vmatprep.subr.bf16.mxu0 %v739_v0 }
  0x47   :  { %606 = vmatpush3.bf16.msra.mxu1 %v605_v29  ;;  %v653_v29 = vpack.c.bf16 %v320_v28, %v319_v27 }
  0x48   :  { %631 = vmatprep.subr.bf16.mxu1 %v739_v0  ;;  %627 = vmatpush3.bf16.msra.mxu0 %v626_v50 }
  0x49   :  { %628 = vmatprep.subr.bf16.mxu0 %v739_v0 }
  0x4c   :  { %630 = vmatpush3.bf16.msra.mxu0 %v629_v62 }
 0x100   :  { %v116_v56 = vpop.f32.mrb[0].mxu0 }
 0x101   :  { %v117_v57 = vadd.f32 %v116_v56, %v45_v55  ;;  %v474_v58 = vpop.f32.mrb[1].mxu0 }
 0x103   :  { %v120_v59 = vmax.f32 %v117_v57, 0.0 }
 0x105   :  { %508 = vmatmul.mubr.f32.vlgmr.msra.gmra.mrb[0].mxu1 %v120_v59 }
 0x106   :  { %577 = vmatprep.mubr.msk.f32.mxu1 %vm740_vm0, %v741_v1  ;;  %633 = vmatpush3.bf16.msra.mxu1 %v632_v4  ;;  %v311_v1 = vld [vmem:[#allocation5 + $0x170] sm:$0xff] }
 0x107   :  { %634 = vmatprep.subr.bf16.mxu1 %v739_v0  ;;  %v641_v11 = vpack.c.bf16 %v312_v10, %v311_v1 }
 0x10a   :  { %636 = vmatpush3.bf16.msra.mxu1 %v635_v6 }
 0x10b   :  { %637 = vmatprep.subr.bf16.mxu1 %v739_v0 }
 0x10e   :  { %639 = vmatpush3.bf16.msra.mxu1 %v638_v9 }
 0x10f   :  { %640 = vmatprep.subr.bf16.mxu1 %v739_v0 }
 0x112   :  { %642 = vmatpush3.bf16.msra.mxu1 %v641_v11 }
 0x113   :  { %643 = vmatprep.subr.bf16.mxu1 %v739_v0 }
 0x116   :  { %645 = vmatpush3.bf16.msra.mxu1 %v644_v14 }
 0x117   :  { %646 = vmatprep.subr.bf16.mxu1 %v739_v0 }
 0x11a   :  { %648 = vmatpush3.bf16.msra.mxu1 %v647_v17 }
 0x11b   :  { %649 = vmatprep.subr.bf16.mxu1 %v739_v0 }
 0x11e   :  { %651 = vmatpush3.bf16.msra.mxu1 %v650_v20 }
 0x11f   :  { %652 = vmatprep.subr.bf16.mxu1 %v739_v0  ;;  %v321_v0 = vld [vmem:[#allocation5 + $0x1c0] sm:$0xff] }
 0x120   :  { %v325_v36 = vrot.slane %v321_v0, %v813_v53 }
 0x122   :  { %654 = vmatpush3.bf16.msra.mxu1 %v653_v29 }
 0x1d8   :  { %v208_v23 = vpop.f32.mrb[0].mxu1 }
 0x1d9   :  { %v209_v24 = vadd.f32 %v208_v23, %v141_v22  ;;  %v509_v25 = vpop.f32.mrb[1].mxu1 }
 0x1db   :  { %v212_v26 = vmax.f32 %v209_v24, 0.0 }
 0x1dd   :  { %543 = vmatmul.mubr.f32.vlgmr.msra.gmra.mrb[2].mxu0 %v212_v26 }
 0x2b0   :  { %v300_v32 = vpop.f32.mrb[2].mxu0 }
 0x2b1   :  { %v301_v33 = vadd.f32 %v300_v32, %v233_v31  ;;  %v544_v34 = vpop.f32.mrb[3].mxu0 }
 0x2b3   :  { %v304_v35 = vmax.f32 %v301_v33, 0.0 }
 0x2b5   :  { %578 = vmatmul.mubr.f32.vlgmr.msra.gmra.mrb[2].mxu1 %v304_v35 }
 0x388   :  { %v392_v37 = vpop.f32.mrb[2].mxu1 }
 0x389   :  { %v393_v38 = vadd.f32 %v392_v37, %v325_v36  ;;  %v579_v39 = vpop.f32.mrb[3].mxu1 }
 0x38b   :  { %396 = vst [vmem:[#allocation7] sm:$0xff] %v393_v38 }
 0x38c   :  { %718 = shalt.err (!%p715_p6)
}
 0x38d   :  { %s719_s10 = scalar_lea.hbm %s842_s2, 128 }
 0x38e   :  { %p720_p7 = scmp.ne.s32.totalorder %s842_s2, %s719_s10  ;;  %p723_p8 = scmp.lt.u32.totalorder %s719_s10, %s842_s2 }
 0x390   :  { %p725_p9 = pnand %p723_p8, %p720_p7 }
 0x392   :  { %728 = shalt.err (!%p725_p9)
}
 0x393   :  { %406 = dma.vmem_to_hbm [thread:$0]  %s404_s6, 128, %s842_s2, [#allocation4]  }
 0x394   :  { %733 = dma.done.wait [#allocation4], 128  }
 0x395   :  { %734 = vsyncadd [#allocation4], 4294967168 }
 0x396   :  { %410 = vsyncpa [#allocation3], 1 }
 0x397   :  { %411 = vsyncpa [#allocation6], 1 }
 0x398   :  { %412 = vsyncpa [#allocation4], 1 }

</bundles_post_ra>
